<compile_context>
chip_gen: v7x
topology: tpu7x:2x2x1
jax: 0.10.0
libtpu: 0.0.40
codegen_flags: <defaults>
</compile_context>

<pallas_src>
import jax
import jax.numpy as jnp
from jax.experimental import pallas as pl
from jax.experimental.pallas import tpu as pltpu

LEAKY_SLOPE = 0.04
MASK_VALUE = -9e15  # matches torch's -9000000000000000.0


# ------------------------------ Pallas kernel ---------------------------------
def gat_kernel(x_ref, xflat_ref, adj_ref, wa_tile_ref, wb_blk_ref, b1_tile_ref,
               w2_blk_ref, b2_ref, h_ref, att_ref):
    # x_ref:       (BT, N, F)      node features of BT graphs
    # xflat_ref:   (BT, 1, N*F)    same features flattened on the lane axis
    # adj_ref:     (BT, N, N)      adjacency (>0 == edge)
    # wa_tile_ref: (F, N*2F)       [Wa | Wa | ... | Wa]      (Wa = W1[:, :F].T)
    # wb_blk_ref:  (N*F, N*2F)     blockdiag(Wb, ..., Wb)    (Wb = W1[:, F:].T)
    # b1_tile_ref: (1, N*2F)       [b1 | b1 | ... | b1]
    # w2_blk_ref:  (N*2F, N)       blockdiag(w2, ..., w2)    (w2 = W2.T, shape (2F,1))
    # b2_ref:      (1, 1)
    # h_ref:       (BT, N, F)      output node features
    # att_ref:     (BT, N, N)      output attention matrices
    BT, N, F = x_ref.shape
    F2 = 2 * F

    x = x_ref[...]                                   # (BT, N, F)
    x2d = x.reshape(BT * N, F)                       # merge leading dims (layout no-op)

    # Pairwise similarity MLP, first layer, fused over all graphs and pairs:
    #   hidden[b, i, j*2F:(j+1)*2F] = relu(x_i @ Wa + x_j @ Wb + b1)
    p = jnp.dot(x2d, wa_tile_ref[...],
                preferred_element_type=jnp.float32)                          # (BT*N, N*2F)
    q = jnp.dot(xflat_ref[...].reshape(BT, N * F), wb_blk_ref[...],
                preferred_element_type=jnp.float32)                          # (BT, N*2F)
    hidden = p.reshape(BT, N, N * F2) + q[:, None, :] + b1_tile_ref[...]
    hidden = jnp.maximum(hidden, 0.0)                                        # (BT, N, N*2F)

    # Second MLP layer -> per-pair scalar logit A[b, i, j] (block-diagonal w2).
    logits = jnp.dot(hidden.reshape(BT * N, N * F2), w2_blk_ref[...],
                     preferred_element_type=jnp.float32) + b2_ref[...]        # (BT*N, N)
    logits = logits.reshape(BT, N, N)

    # LeakyReLU(negative_slope=0.04)
    e = jnp.where(logits > 0, logits, LEAKY_SLOPE * logits)

    # Mask non-edges and softmax over destination nodes (last axis).
    masked = jnp.where(adj_ref[...] > 0, e, MASK_VALUE)
    m = jnp.max(masked, axis=-1, keepdims=True)
    unnorm = jnp.exp(masked - m)
    att = unnorm / jnp.sum(unnorm, axis=-1, keepdims=True)

    att_ref[...] = att
    # next_H = attention @ input   (batched over the BT graphs in this tile)
    h_ref[...] = jnp.einsum('bij,bjf->bif', att, x,
                            preferred_element_type=jnp.float32)


# ------------------------------- wrapper ---------------------------------------
def _pick_batch_tile(batch, cap=8):
    """Largest divisor of `batch` not exceeding `cap` (graphs per grid step)."""
    for bt in range(min(batch, cap), 0, -1):
        if batch % bt == 0:
            return bt
    return 1


@jax.jit
def gat_forward(x, adj, W1, b1, W2, b2):
    """Fused GAT layer forward.

    x:   (B, N, F) float32 node features
    adj: (B, N, N) float32 adjacency (>0 == edge)
    W1:  (2F, 2F), b1: (2F,)   first linear of w_a (torch layout: y = x @ W.T + b)
    W2:  (1, 2F),  b2: (1,)    second linear of w_a
    returns (next_H (B,N,F), attention (B,N,N))
    """
    B, N, F = x.shape
    F2 = 2 * F
    BT = _pick_batch_tile(B)
    G = B // BT

    # ---- weight packing (wrapper side, plain XLA ops, done once per call) ----
    Wa = W1[:, :F].T                                              # (F, 2F)
    Wb = W1[:, F:].T                                              # (F, 2F)
    wa_tile = jnp.tile(Wa, (1, N))                                # (F, N*2F)
    wb_blk = jax.scipy.linalg.block_diag(*([Wb] * N))             # (N*F, N*2F)
    b1_tile = jnp.tile(b1.reshape(1, F2), (1, N))                 # (1, N*2F)
    w2_blk = jax.scipy.linalg.block_diag(*([W2.T] * N))           # (N*2F, N)
    b2_arr = b2.reshape(1, 1)

    x_flat = x.reshape(B, 1, N * F)                               # lane-dense view of x

    in_specs = [
        pl.BlockSpec((BT, N, F), lambda g: (g, 0, 0)),            # x
        pl.BlockSpec((BT, 1, N * F), lambda g: (g, 0, 0)),        # x_flat
        pl.BlockSpec((BT, N, N), lambda g: (g, 0, 0)),            # adj
        pl.BlockSpec((F, N * F2), lambda g: (0, 0)),              # wa_tile
        pl.BlockSpec((N * F, N * F2), lambda g: (0, 0)),          # wb_blk
        pl.BlockSpec((1, N * F2), lambda g: (0, 0)),              # b1_tile
        pl.BlockSpec((N * F2, N), lambda g: (0, 0)),              # w2_blk
        pl.BlockSpec((1, 1), lambda g: (0, 0)),                   # b2
    ]
    out_specs = (
        pl.BlockSpec((BT, N, F), lambda g: (g, 0, 0)),            # next_H
        pl.BlockSpec((BT, N, N), lambda g: (g, 0, 0)),            # attention
    )

    next_h, att = pl.pallas_call(
        gat_kernel,
        out_shape=(jax.ShapeDtypeStruct((B, N, F), jnp.float32),
                   jax.ShapeDtypeStruct((B, N, N), jnp.float32)),
        grid=(G,),
        in_specs=in_specs,
        out_specs=out_specs,
        compiler_params=pltpu.CompilerParams(
            dimension_semantics=("parallel",)),
    )(x, x_flat, adj, wa_tile, wb_blk, b1_tile, w2_blk, b2_arr)
    return next_h, att


# --------------------------- pure-JAX reference ---------------------------------
def gat_forward_ref(x, adj, W1, b1, W2, b2):
    B, N, F = x.shape
    xi = jnp.repeat(x, N, axis=1)                 # (B, N*N, F): row k=(i*N+j) -> x_i
    xj = jnp.tile(x, (1, N, 1))                   # (B, N*N, F): row k=(i*N+j) -> x_j
    pair = jnp.concatenate([xi, xj], axis=-1)     # (B, N*N, 2F)
    h = jnp.maximum(pair @ W1.T + b1, 0.0)
    a = (h @ W2.T + b2).reshape(B, N, N)
    e = jnp.where(a > 0, a, LEAKY_SLOPE * a)
    masked = jnp.where(adj > 0, e, MASK_VALUE)
    att = jax.nn.softmax(masked, axis=-1)
    next_h = jnp.einsum('bij,bjf->bif', att, x)
    return next_h, att


def init_gat_params(key, in_features):
    F2 = 2 * in_features
    k1, k2, k3, k4 = jax.random.split(key, 4)
    s1 = (2.0 / (F2 + F2)) ** 0.5
    W1 = s1 * jax.random.normal(k1, (F2, F2), jnp.float32)
    b1 = 0.01 * jax.random.normal(k2, (F2,), jnp.float32)
    s2 = (2.0 / (F2 + 1)) ** 0.5
    W2 = s2 * jax.random.normal(k3, (1, F2), jnp.float32)
    b2 = 0.01 * jax.random.normal(k4, (1,), jnp.float32)
    return W1, b1, W2, b2


# ----------------------------------- main ---------------------------------------
if __name__ == "__main__":
    key = jax.random.PRNGKey(0)
    k_x, k_adj, k_p = jax.random.split(key, 3)

    B, N, F = 2, 8, 16
    x = jax.random.normal(k_x, (B, N, F), jnp.float32)

    # random 0/1 adjacency with self-loops (every row has at least one edge)
    adj = (jax.random.uniform(k_adj, (B, N, N)) > 0.5).astype(jnp.float32)
    adj = jnp.maximum(adj, jnp.eye(N, dtype=jnp.float32)[None])

    W1, b1, W2, b2 = init_gat_params(k_p, F)

    next_h, att = gat_forward(x, adj, W1, b1, W2, b2)
    next_h = jax.block_until_ready(next_h)
    att = jax.block_until_ready(att)

    ref_h, ref_att = gat_forward_ref(x, adj, W1, b1, W2, b2)

    assert next_h.shape == (B, N, F), next_h.shape
    assert att.shape == (B, N, N), att.shape
    assert jnp.allclose(att, ref_att, atol=1e-4, rtol=1e-4), "attention mismatch"
    assert jnp.allclose(next_h, ref_h, atol=1e-4, rtol=1e-4), "output mismatch"

    # Module's second return value: attention[0, 0, :] pulled to host (numpy).
    att_row = jax.device_get(att[0, 0, :])
    assert att_row.shape == (N,)

    print("KERNEL_OK")
</pallas_src>

<mosaic_0001>
module attributes {stable_mosaic.version = 11 : i64} {
  func.func @gat_kernel(%arg0: i32, %arg1: memref<2x8x16xf32, #tpu.memory_space<vmem>>, %arg2: memref<2x1x128xf32, #tpu.memory_space<vmem>>, %arg3: memref<2x8x8xf32, #tpu.memory_space<vmem>>, %arg4: memref<16x256xf32, #tpu.memory_space<vmem>>, %arg5: memref<128x256xf32, #tpu.memory_space<vmem>>, %arg6: memref<1x256xf32, #tpu.memory_space<vmem>>, %arg7: memref<256x8xf32, #tpu.memory_space<vmem>>, %arg8: memref<1x1xf32, #tpu.memory_space<vmem>>, %arg9: memref<2x8x16xf32, #tpu.memory_space<vmem>>, %arg10: memref<2x8x8xf32, #tpu.memory_space<vmem>>) attributes {dimension_semantics = [#tpu.dimension_semantics<parallel>], iteration_bounds = array<i64: 1>, scalar_prefetch = 0 : i64, scratch_operands = 0 : i64, tpu.core_type = #tpu.core_type<tc>, window_params = [{transform_indices = @transform_0, window_bounds = array<i64: 2, 8, 16>}, {transform_indices = @transform_1, window_bounds = array<i64: 2, 1, 128>}, {transform_indices = @transform_2, window_bounds = array<i64: 2, 8, 8>}, {pipeline_mode = #tpu.pipeline_mode<synchronous>, transform_indices = @transform_3, window_bounds = array<i64: 16, 256>}, {pipeline_mode = #tpu.pipeline_mode<synchronous>, transform_indices = @transform_4, window_bounds = array<i64: 128, 256>}, {pipeline_mode = #tpu.pipeline_mode<synchronous>, transform_indices = @transform_5, window_bounds = array<i64: 1, 256>}, {pipeline_mode = #tpu.pipeline_mode<synchronous>, transform_indices = @transform_6, window_bounds = array<i64: 256, 8>}, {pipeline_mode = #tpu.pipeline_mode<synchronous>, transform_indices = @transform_7, window_bounds = array<i64: 1, 1>}, {transform_indices = @transform_8, window_bounds = array<i64: 2, 8, 16>}, {transform_indices = @transform_9, window_bounds = array<i64: 2, 8, 8>}]} {
    %c0 = arith.constant 0 : index
    %c0_0 = arith.constant 0 : index
    %c0_1 = arith.constant 0 : index
    %0 = vector.load %arg1[%c0, %c0_0, %c0_1] : memref<2x8x16xf32, #tpu.memory_space<vmem>>, vector<2x8x16xf32>
    %1 = vector.shape_cast %0 : vector<2x8x16xf32> to vector<16x16xf32>
    %c0_2 = arith.constant 0 : index
    %c0_3 = arith.constant 0 : index
    %2 = vector.load %arg4[%c0_2, %c0_3] : memref<16x256xf32, #tpu.memory_space<vmem>>, vector<16x256xf32>
    %cst = arith.constant dense<0.000000e+00> : vector<16x256xf32>
    %3 = tpu.matmul %1, %2, %cst {dimension_numbers = #tpu.dot_dimension_numbers<[1], [0], [0], [1], [0, 0, 1, 1], [], []>} : vector<16x16xf32>, vector<16x256xf32>, vector<16x256xf32> -> vector<16x256xf32>
    %c0_4 = arith.constant 0 : index
    %c0_5 = arith.constant 0 : index
    %c0_6 = arith.constant 0 : index
    %4 = vector.load %arg2[%c0_4, %c0_5, %c0_6] : memref<2x1x128xf32, #tpu.memory_space<vmem>>, vector<2x1x128xf32>
    %5 = vector.shape_cast %4 : vector<2x1x128xf32> to vector<2x128xf32>
    %c0_7 = arith.constant 0 : index
    %c0_8 = arith.constant 0 : index
    %6 = vector.load %arg5[%c0_7, %c0_8] : memref<128x256xf32, #tpu.memory_space<vmem>>, vector<128x256xf32>
    %cst_9 = arith.constant dense<0.000000e+00> : vector<2x256xf32>
    %7 = tpu.matmul %5, %6, %cst_9 {dimension_numbers = #tpu.dot_dimension_numbers<[1], [0], [0], [1], [0, 0, 1, 1], [], []>} : vector<2x128xf32>, vector<128x256xf32>, vector<2x256xf32> -> vector<2x256xf32>
    %8 = vector.shape_cast %3 : vector<16x256xf32> to vector<2x8x256xf32>
    %9 = vector.shape_cast %7 : vector<2x256xf32> to vector<2x1x256xf32>
    %10 = vector.broadcast %9 : vector<2x1x256xf32> to vector<2x8x256xf32>
    %11 = arith.addf %8, %10 : vector<2x8x256xf32>
    %c0_10 = arith.constant 0 : index
    %c0_11 = arith.constant 0 : index
    %12 = vector.load %arg6[%c0_10, %c0_11] : memref<1x256xf32, #tpu.memory_space<vmem>>, vector<1x256xf32>
    %13 = vector.shape_cast %12 : vector<1x256xf32> to vector<1x1x256xf32>
    %14 = vector.broadcast %13 : vector<1x1x256xf32> to vector<2x8x256xf32>
    %15 = arith.addf %11, %14 : vector<2x8x256xf32>
    %cst_12 = arith.constant 0.000000e+00 : f32
    %16 = vector.broadcast %cst_12 : f32 to vector<2x8x256xf32>
    %17 = arith.maximumf %15, %16 : vector<2x8x256xf32>
    %18 = vector.shape_cast %17 : vector<2x8x256xf32> to vector<16x256xf32>
    %c0_13 = arith.constant 0 : index
    %c0_14 = arith.constant 0 : index
    %19 = vector.load %arg7[%c0_13, %c0_14] : memref<256x8xf32, #tpu.memory_space<vmem>>, vector<256x8xf32>
    %cst_15 = arith.constant dense<0.000000e+00> : vector<16x8xf32>
    %20 = tpu.matmul %18, %19, %cst_15 {dimension_numbers = #tpu.dot_dimension_numbers<[1], [0], [0], [1], [0, 0, 1, 1], [], []>} : vector<16x256xf32>, vector<256x8xf32>, vector<16x8xf32> -> vector<16x8xf32>
    %c0_16 = arith.constant 0 : index
    %c0_17 = arith.constant 0 : index
    %21 = vector.load %arg8[%c0_16, %c0_17] : memref<1x1xf32, #tpu.memory_space<vmem>>, vector<1x1xf32>
    %22 = vector.broadcast %21 : vector<1x1xf32> to vector<16x8xf32>
    %23 = arith.addf %20, %22 : vector<16x8xf32>
    %24 = vector.shape_cast %23 : vector<16x8xf32> to vector<2x8x8xf32>
    %cst_18 = arith.constant 0.000000e+00 : f32
    %25 = vector.broadcast %cst_18 : f32 to vector<2x8x8xf32>
    %26 = arith.cmpf ogt, %24, %25 : vector<2x8x8xf32>
    %cst_19 = arith.constant 4.000000e-02 : f32
    %27 = vector.broadcast %cst_19 : f32 to vector<2x8x8xf32>
    %28 = arith.mulf %27, %24 : vector<2x8x8xf32>
    %29 = arith.select %26, %24, %28 : vector<2x8x8xi1>, vector<2x8x8xf32>
    %c0_20 = arith.constant 0 : index
    %c0_21 = arith.constant 0 : index
    %c0_22 = arith.constant 0 : index
    %30 = vector.load %arg3[%c0_20, %c0_21, %c0_22] : memref<2x8x8xf32, #tpu.memory_space<vmem>>, vector<2x8x8xf32>
    %cst_23 = arith.constant 0.000000e+00 : f32
    %31 = vector.broadcast %cst_23 : f32 to vector<2x8x8xf32>
    %32 = arith.cmpf ogt, %30, %31 : vector<2x8x8xf32>
    %cst_24 = arith.constant -9.000000e+15 : f32
    %33 = vector.broadcast %cst_24 : f32 to vector<2x8x8xf32>
    %34 = arith.select %32, %29, %33 : vector<2x8x8xi1>, vector<2x8x8xf32>
    %cst_25 = arith.constant dense<0xFF800000> : vector<2x8xf32>
    %35 = vector.multi_reduction <maximumf>, %34, %cst_25 [2] : vector<2x8x8xf32> to vector<2x8xf32>
    %36 = vector.shape_cast %35 : vector<2x8xf32> to vector<2x8x1xf32>
    %37 = vector.broadcast %36 : vector<2x8x1xf32> to vector<2x8x8xf32>
    %38 = arith.subf %34, %37 : vector<2x8x8xf32>
    %39 = math.exp %38 : vector<2x8x8xf32>
    %cst_26 = arith.constant dense<0.000000e+00> : vector<2x8xf32>
    %40 = vector.multi_reduction <add>, %39, %cst_26 [2] : vector<2x8x8xf32> to vector<2x8xf32>
    %41 = vector.shape_cast %40 : vector<2x8xf32> to vector<2x8x1xf32>
    %42 = vector.broadcast %41 : vector<2x8x1xf32> to vector<2x8x8xf32>
    %43 = arith.divf %39, %42 : vector<2x8x8xf32>
    %c0_27 = arith.constant 0 : index
    %c0_28 = arith.constant 0 : index
    %c0_29 = arith.constant 0 : index
    %44 = vector.load %arg10[%c0_27, %c0_28, %c0_29] : memref<2x8x8xf32, #tpu.memory_space<vmem>>, vector<2x8x8xf32>
    tpu.vector_store %arg10[%c0_27, %c0_28, %c0_29], %43 {strides = array<i32>} : memref<2x8x8xf32, #tpu.memory_space<vmem>>, vector<2x8x8xf32>,
    "tpu.trace_start"() <{level = 10 : i32, message = "bij,bjf->bif"}> : () -> ()
    %cst_30 = arith.constant dense<0.000000e+00> : vector<2x8x16xf32>
    %45 = tpu.matmul %43, %0, %cst_30 {dimension_numbers = #tpu.dot_dimension_numbers<[2], [1], [1], [2], [0, 0, 0, 1, 1, 2], [0], [0]>} : vector<2x8x8xf32>, vector<2x8x16xf32>, vector<2x8x16xf32> -> vector<2x8x16xf32>
    "tpu.trace_stop"() : () -> ()
    %c0_31 = arith.constant 0 : index
    %c0_32 = arith.constant 0 : index
    %c0_33 = arith.constant 0 : index
    %46 = vector.load %arg9[%c0_31, %c0_32, %c0_33] : memref<2x8x16xf32, #tpu.memory_space<vmem>>, vector<2x8x16xf32>
    tpu.vector_store %arg9[%c0_31, %c0_32, %c0_33], %45 {strides = array<i32>} : memref<2x8x16xf32, #tpu.memory_space<vmem>>, vector<2x8x16xf32>,
    return
  }
  func.func @transform_0(%arg0: i32) -> (i32, i32, i32) {
    %c0_i32 = arith.constant 0 : i32
    %c0_i32_0 = arith.constant 0 : i32
    %c0_i32_1 = arith.constant 0 : i32
    return %arg0, %c0_i32, %c0_i32_0 : i32, i32, i32
  }
  func.func @transform_1(%arg0: i32) -> (i32, i32, i32) {
    %c0_i32 = arith.constant 0 : i32
    %c0_i32_0 = arith.constant 0 : i32
    %c0_i32_1 = arith.constant 0 : i32
    return %arg0, %c0_i32, %c0_i32_0 : i32, i32, i32
  }
  func.func @transform_2(%arg0: i32) -> (i32, i32, i32) {
    %c0_i32 = arith.constant 0 : i32
    %c0_i32_0 = arith.constant 0 : i32
    %c0_i32_1 = arith.constant 0 : i32
    return %arg0, %c0_i32, %c0_i32_0 : i32, i32, i32
  }
  func.func @transform_3(%arg0: i32) -> (i32, i32) {
    %c0_i32 = arith.constant 0 : i32
    %c0_i32_0 = arith.constant 0 : i32
    %c0_i32_1 = arith.constant 0 : i32
    return %c0_i32, %c0_i32_0 : i32, i32
  }
  func.func @transform_4(%arg0: i32) -> (i32, i32) {
    %c0_i32 = arith.constant 0 : i32
    %c0_i32_0 = arith.constant 0 : i32
    %c0_i32_1 = arith.constant 0 : i32
    return %c0_i32, %c0_i32_0 : i32, i32
  }
  func.func @transform_5(%arg0: i32) -> (i32, i32) {
    %c0_i32 = arith.constant 0 : i32
    %c0_i32_0 = arith.constant 0 : i32
    %c0_i32_1 = arith.constant 0 : i32
    return %c0_i32, %c0_i32_0 : i32, i32
  }
  func.func @transform_6(%arg0: i32) -> (i32, i32) {
    %c0_i32 = arith.constant 0 : i32
    %c0_i32_0 = arith.constant 0 : i32
    %c0_i32_1 = arith.constant 0 : i32
    return %c0_i32, %c0_i32_0 : i32, i32
  }
  func.func @transform_7(%arg0: i32) -> (i32, i32) {
    %c0_i32 = arith.constant 0 : i32
    %c0_i32_0 = arith.constant 0 : i32
    %c0_i32_1 = arith.constant 0 : i32
    return %c0_i32, %c0_i32_0 : i32, i32
  }
  func.func @transform_8(%arg0: i32) -> (i32, i32, i32) {
    %c0_i32 = arith.constant 0 : i32
    %c0_i32_0 = arith.constant 0 : i32
    %c0_i32_1 = arith.constant 0 : i32
    return %arg0, %c0_i32, %c0_i32_0 : i32, i32, i32
  }
  func.func @transform_9(%arg0: i32) -> (i32, i32, i32) {
    %c0_i32 = arith.constant 0 : i32
    %c0_i32_0 = arith.constant 0 : i32
    %c0_i32_1 = arith.constant 0 : i32
    return %arg0, %c0_i32, %c0_i32_0 : i32, i32, i32
  }
}

</mosaic_0001>

<bundles_post_ra>
// kernel: tile.13
= control target key start
LH: loop header
LB: loop body
LE: loop exit
PB: predicated region body
PF: predicated region fallthrough
CT: control target
= control target key end

     0   :  { %vm48_vm0 = vcmask 1047556   ;;  %s227_s14 = smov 96   ;;  %vm3_vm1 = vcmask 261120   ;;  %s228_s20 = smov 64   ;;  %vm52_vm2 = vcmask 1048320   ;;  %vm95_vm3 = vcmask 785920   ;;  %s436_s0 = inlined_call_operand.vmem [shape: f32[16,8,32], index: 0, kind: input, shape index: {}]   ;;  %s437_s1 = inlined_call_operand.vmem [shape: f32[16,256], index: 1, kind: output, shape index: {}]  }
   0x1   :  { %v196_v0 = vld [vmem:[%s436_s0 + $0x43] ss:$8 sm:$0xf]   ;;  %v199_v6 = vld [vmem:[%s436_s0 + $0x47] ss:$8 sm:$0xf]  }
   0x2   :  { %v197_v1 = vld [vmem:[%s436_s0 + $0x43] ss:$8 sm:$0xf0]   ;;  %v200_v7 = vld [vmem:[%s436_s0 + $0x47] ss:$8 sm:$0xf0]  }
   0x3   :  { %v70_v2 = vsel %vm48_vm0, %v197_v1, %v196_v0  ;;  %v191_v3 = vld [vmem:[%s436_s0 + $0x3] ss:$8 sm:$0xf]   ;;  %v81_v8 = vsel %vm48_vm0, %v200_v7, %v199_v6  ;;  %v193_v9 = vld [vmem:[%s436_s0 + $0x7] ss:$8 sm:$0xf]  }
   0x4   :  { %v192_v4 = vld [vmem:[%s436_s0 + $0x3] ss:$8 sm:$0xf0]   ;;  %71 = vrot.lane.b32.xlu1 %v70_v2, %s227_s14  ;;  %v194_v10 = vld [vmem:[%s436_s0 + $0x7] ss:$8 sm:$0xf0]  }
   0x5   :  { %v49_v5 = vsel %vm48_vm0, %v192_v4, %v191_v3  ;;  %v59_v11 = vsel %vm48_vm0, %v194_v10, %v193_v9  ;;  %v204_v12 = vld [vmem:[%s436_s0 + $0x6] ss:$8 sm:$0xf]   ;;  %v202_v14 = vld [vmem:[%s436_s0 + $0x2] ss:$8 sm:$0xf]  }
   0x6   :  { %50 = vrot.lane.b32.xlu0 %v49_v5, %s227_s14  ;;  %v205_v13 = vld [vmem:[%s436_s0 + $0x6] ss:$8 sm:$0xf0]   ;;  %v203_v15 = vld [vmem:[%s436_s0 + $0x2] ss:$8 sm:$0xf0]  }
   0x7   :  { %v102_v16 = vsel %vm48_vm0, %v205_v13, %v204_v12  ;;  %v210_v17 = vld [vmem:[%s436_s0 + $0x46] ss:$8 sm:$0xf]   ;;  %v92_v18 = vsel %vm48_vm0, %v203_v15, %v202_v14  ;;  %v2_v20 = vld [vmem:[%s436_s0] ss:$4 sm:$0xff]   ;;  %vm138_vm4 = vcmask 523520  }
   0x8   :  { %82 = vrot.lane.b32.xlu1 %v81_v8, %s227_s14  ;;  %v211_v19 = vld [vmem:[%s436_s0 + $0x46] ss:$8 sm:$0xf0]   ;;  %v207_v21 = vld [vmem:[%s436_s0 + $0x42] ss:$8 sm:$0xf]  }
   0x9   :  { %v208_v22 = vld [vmem:[%s436_s0 + $0x42] ss:$8 sm:$0xf0]   ;;  %4 = vst.msk [vmem:[%s437_s1] ss:$8 sm:$0x3] %vm3_vm1, %v2_v20   ;;  %v124_v24 = vsel %vm48_vm0, %v211_v19, %v210_v17 }
   0xa   :  { %60 = vrot.lane.b32.xlu0 %v59_v11, %s227_s14  ;;  %173 = vst.msk [vmem:[%s437_s1 - $0xf] ss:$8 sm:$0xc] %vm3_vm1, %v2_v20   ;;  %174 = vst.msk [vmem:[%s437_s1 - $0x1e] ss:$8 sm:$0x30] %vm3_vm1, %v2_v20   ;;  %v113_v27 = vsel %vm48_vm0, %v208_v22, %v207_v21 }
   0xb   :  { %175 = vst.msk [vmem:[%s437_s1 - $0x2d] ss:$8 sm:$0xc0] %vm3_vm1, %v2_v20   ;;  %v215_v23 = vld [vmem:[%s436_s0 + $0x5] ss:$8 sm:$0xf]  }
   0xc   :  { %103 = vrot.lane.b32.xlu1 %v102_v16, %s228_s20  ;;  %v216_v25 = vld [vmem:[%s436_s0 + $0x5] ss:$8 sm:$0xf0]   ;;  %v213_v26 = vld [vmem:[%s436_s0 + $0x1] ss:$8 sm:$0xf]  }
   0xd   :  { %v214_v28 = vld [vmem:[%s436_s0 + $0x1] ss:$8 sm:$0xf0]   ;;  %v176_v29 = vld [vmem:[%s436_s0 + $0x20] ss:$4 sm:$0xff]   ;;  %v145_v32 = vsel %vm48_vm0, %v216_v25, %v215_v23 }
   0xe   :  { %93 = vrot.lane.b32.xlu0 %v92_v18, %s228_s20  ;;  %177 = vst.msk [vmem:[%s437_s1 + $0x4] ss:$8 sm:$0x3] %vm3_vm1, %v176_v29   ;;  %178 = vst.msk [vmem:[%s437_s1 - $0xb] ss:$8 sm:$0xc] %vm3_vm1, %v176_v29   ;;  %v135_v33 = vsel %vm48_vm0, %v214_v28, %v213_v26 }
   0xf   :  { %179 = vst.msk [vmem:[%s437_s1 - $0x1a] ss:$8 sm:$0x30] %vm3_vm1, %v176_v29   ;;  %180 = vst.msk [vmem:[%s437_s1 - $0x29] ss:$8 sm:$0xc0] %vm3_vm1, %v176_v29  }
  0x10   :  { %v181_v30 = vld [vmem:[%s436_s0 + $0x40] ss:$4 sm:$0xff]   ;;  %125 = vrot.lane.b32.xlu1 %v124_v24, %s228_s20  ;;  %v221_v34 = vld [vmem:[%s436_s0 + $0x45] ss:$8 sm:$0xf]  }
  0x11   :  { %v186_v31 = vld [vmem:[%s436_s0 + $0x60] ss:$4 sm:$0xff]   ;;  %182 = vst.msk [vmem:[%s437_s1 + $0x10] ss:$8 sm:$0x3] %vm3_vm1, %v181_v30  }
  0x12   :  { %183 = vst.msk [vmem:[%s437_s1 + $0x1] ss:$8 sm:$0xc] %vm3_vm1, %v181_v30   ;;  %184 = vst.msk [vmem:[%s437_s1 - $0xe] ss:$8 sm:$0x30] %vm3_vm1, %v181_v30   ;;  %114 = vrot.lane.b32.xlu0 %v113_v27, %s228_s20 }
  0x13   :  { %185 = vst.msk [vmem:[%s437_s1 - $0x1d] ss:$8 sm:$0xc0] %vm3_vm1, %v181_v30   ;;  %187 = vst.msk [vmem:[%s437_s1 + $0x14] ss:$8 sm:$0x3] %vm3_vm1, %v186_v31  }
  0x14   :  { %188 = vst.msk [vmem:[%s437_s1 + $0x5] ss:$8 sm:$0xc] %vm3_vm1, %v186_v31   ;;  %189 = vst.msk [vmem:[%s437_s1 - $0xa] ss:$8 sm:$0x30] %vm3_vm1, %v186_v31  }
  0x15   :  { %190 = vst.msk [vmem:[%s437_s1 - $0x19] ss:$8 sm:$0xc0] %vm3_vm1, %v186_v31   ;;  %v222_v35 = vld [vmem:[%s436_s0 + $0x45] ss:$8 sm:$0xf0]  }
  0x16   :  { %v218_v36 = vld [vmem:[%s436_s0 + $0x41] ss:$8 sm:$0xf]   ;;  %v167_v38 = vsel %vm48_vm0, %v222_v35, %v221_v34 }
  0x17   :  { %v219_v37 = vld [vmem:[%s436_s0 + $0x41] ss:$8 sm:$0xf0]   ;;  %s229_s0 = smov 32  }
  0x18   :  { %146 = vrot.lane.b32.xlu1 %v145_v32, %s229_s0  ;;  %136 = vrot.lane.b32.xlu0 %v135_v33, %s229_s0  ;;  %v156_v39 = vsel %vm48_vm0, %v219_v37, %v218_v36 }
  0x1c   :  { %168 = vrot.lane.b32.xlu1 %v167_v38, %s229_s0  ;;  %157 = vrot.lane.b32.xlu0 %v156_v39, %s229_s0 }
  0x76   :  { %v72_v40 = vpop.permute.xlu1 %71  }
  0x77   :  { %198 = vst.msk [vmem:[%s437_s1 + $0x10] sm:$0xff] %vm52_vm2, %v72_v40  }
  0x78   :  { %v51_v41 = vpop.permute.xlu0 %50  }
  0x79   :  { %53 = vst.msk [vmem:[%s437_s1] sm:$0xff] %vm52_vm2, %v51_v41  }
  0x7a   :  { %v83_v42 = vpop.permute.xlu1 %82  }
  0x7b   :  { %201 = vst.msk [vmem:[%s437_s1 + $0x18] sm:$0xff] %vm52_vm2, %v83_v42  }
  0x7c   :  { %v61_v43 = vpop.permute.xlu0 %60  }
  0x7d   :  { %195 = vst.msk [vmem:[%s437_s1 + $0x8] sm:$0xff] %vm52_vm2, %v61_v43  }
  0x7e   :  { %v104_v44 = vpop.permute.xlu1 %103  }
  0x7f   :  { %206 = vst.msk [vmem:[%s437_s1 + $0x8] sm:$0xff] %vm95_vm3, %v104_v44  }
  0x80   :  { %v94_v45 = vpop.permute.xlu0 %93  }
  0x81   :  { %96 = vst.msk [vmem:[%s437_s1] sm:$0xff] %vm95_vm3, %v94_v45  }
  0x82   :  { %v126_v46 = vpop.permute.xlu1 %125  }
  0x83   :  { %212 = vst.msk [vmem:[%s437_s1 + $0x18] sm:$0xff] %vm95_vm3, %v126_v46  }
  0x84   :  { %v115_v47 = vpop.permute.xlu0 %114  }
  0x85   :  { %209 = vst.msk [vmem:[%s437_s1 + $0x10] sm:$0xff] %vm95_vm3, %v115_v47  }
  0x8a   :  { %v147_v48 = vpop.permute.xlu1 %146   ;;  %v137_v49 = vpop.permute.xlu0 %136  }
  0x8b   :  { %217 = vst.msk [vmem:[%s437_s1 + $0x8] sm:$0xff] %vm138_vm4, %v147_v48   ;;  %139 = vst.msk [vmem:[%s437_s1] sm:$0xff] %vm138_vm4, %v137_v49  }
  0x8e   :  { %v169_v50 = vpop.permute.xlu1 %168   ;;  %v158_v51 = vpop.permute.xlu0 %157  }
  0x8f   :  { %223 = vst.msk [vmem:[%s437_s1 + $0x18] sm:$0xff] %vm138_vm4, %v169_v50   ;;  %220 = vst.msk [vmem:[%s437_s1 + $0x10] sm:$0xff] %vm138_vm4, %v158_v51  }

// kernel: gat_forward.1
= control target key start
LH: loop header
LB: loop body
LE: loop exit
PB: predicated region body
PF: predicated region fallthrough
CT: control target
= control target key end

     0   :  { %s1190_s0 = inlined_call_operand.vmem [shape: f32[2,8,16], index: 0, kind: input, shape index: {}]   ;;  %s1191_s1 = inlined_call_operand.vmem [shape: f32[2,1,128], index: 1, kind: input, shape index: {}]   ;;  %s1192_s2 = inlined_call_operand.vmem [shape: f32[2,8,8], index: 2, kind: input, shape index: {}]   ;;  %s1193_s3 = inlined_call_operand.vmem [shape: f32[16,256], index: 3, kind: input, shape index: {}]   ;;  %s1194_s4 = inlined_call_operand.vmem [shape: f32[128,256], index: 4, kind: input, shape index: {}]   ;;  %s1195_s5 = inlined_call_operand.vmem [shape: f32[1,256], index: 5, kind: input, shape index: {}]   ;;  %s1196_s6 = inlined_call_operand.vmem [shape: f32[256,8], index: 6, kind: input, shape index: {}]   ;;  %s1197_s7 = inlined_call_operand.<no memory space> [shape: f32[1,1], index: 7, kind: input, shape index: {}]   ;;  %s1198_s8 = inlined_call_operand.hbm [shape: f32[2,8,16], index: 8, kind: output, shape index: {0}]   ;;  %s1199_s9 = inlined_call_operand.hbm [shape: f32[2,8,8], index: 9, kind: output, shape index: {1}]  }
   0x1   :  { %v15_v0 = vstv %s1197_s7 }
   0x2   :  { %16 = vst [vmem:[#allocation2] sm:$0x1] %v15_v0 }
   0x3   :  { %17 = vsyncpa [#allocation4], 0  ;;  %v128_v1 = vld [vmem:[%s1194_s4 + $0x8] sm:$0xff]  ;;  %v130_v2 = vld [vmem:[%s1194_s4 + $0x18] sm:$0xff]  ;;  %v841_v8 = vmov 0.0   ;;  %v165_v47 = vlaneseq  ;;  %vm41_vm0 = vcmask 130048  }
   0x4   :  { %v127_v3 = vld [vmem:[%s1194_s4] sm:$0xff]  ;;  %v712_v4 = vpack.c.bf16 %v130_v2, %v128_v1  ;;  %v129_v5 = vld [vmem:[%s1194_s4 + $0x10] sm:$0xff]  ;;  %v132_v6 = vld [vmem:[%s1194_s4 + $0x28] sm:$0xff]  ;;  %241 = vmatprep.mubr.f32.mxu1 %v841_v8  ;;  %112 = vmatprep.mubr.f32.mxu0 %v841_v8  ;;  %v842_v45 = vmov 1966171168  }
   0x5   :  { %v134_v7 = vld [vmem:[%s1194_s4 + $0x38] sm:$0xff]  ;;  %v714_v9 = vpack.c.bf16 %v129_v5, %v127_v3  ;;  %v131_v11 = vld [vmem:[%s1194_s4 + $0x20] sm:$0xff]  ;;  %v133_v12 = vld [vmem:[%s1194_s4 + $0x30] sm:$0xff]  ;;  %v163_v46 = vunpack.c.l.s4 %v842_v45 }
   0x6   :  { %v716_v10 = vpack.c.bf16 %v134_v7, %v132_v6  ;;  %v136_v13 = vld [vmem:[%s1194_s4 + $0x48] sm:$0xff]  ;;  %713 = vmatprep.subr.bf16.mxu1 %v712_v4  ;;  %v138_v14 = vld [vmem:[%s1194_s4 + $0x58] sm:$0xff]  ;;  %v718_v15 = vpack.c.bf16 %v133_v12, %v131_v11  ;;  %v135_v17 = vld [vmem:[%s1194_s4 + $0x40] sm:$0xff] }
   0x7   :  { %715 = vmatpush1.bf16.msra.mxu1 %v714_v9  ;;  %v720_v16 = vpack.c.bf16 %v138_v14, %v136_v13  ;;  %v137_v18 = vld [vmem:[%s1194_s4 + $0x50] sm:$0xff]  ;;  %v140_v19 = vld [vmem:[%s1194_s4 + $0x68] sm:$0xff]  ;;  %v142_v20 = vld [vmem:[%s1194_s4 + $0x78] sm:$0xff] }
   0x8   :  { %717 = vmatprep.subr.bf16.mxu1 %v716_v10  ;;  %v722_v21 = vpack.c.bf16 %v137_v18, %v135_v17  ;;  %v724_v22 = vpack.c.bf16 %v142_v20, %v140_v19  ;;  %v139_v23 = vld [vmem:[%s1194_s4 + $0x60] sm:$0xff]  ;;  %v141_v24 = vld [vmem:[%s1194_s4 + $0x70] sm:$0xff]  ;;  %v144_v25 = vld [vmem:[%s1194_s4 + $0x88] sm:$0xff] }
   0x9   :  { %v146_v26 = vld [vmem:[%s1194_s4 + $0x98] sm:$0xff]  ;;  %v143_v27 = vld [vmem:[%s1194_s4 + $0x80] sm:$0xff]  ;;  %v145_v28 = vld [vmem:[%s1194_s4 + $0x90] sm:$0xff]  ;;  %v726_v31 = vpack.c.bf16 %v141_v24, %v139_v23 }
   0xa   :  { %v38_v29 = vld [vmem:[%s1193_s3 + $0x8] sm:$0xff]  ;;  %v40_v30 = vld [vmem:[%s1193_s3 + $0x18] sm:$0xff]  ;;  %v37_v34 = vld [vmem:[%s1193_s3] sm:$0xff]  ;;  %v728_v36 = vpack.c.bf16 %v146_v26, %v144_v25  ;;  %v730_v51 = vpack.c.bf16 %v145_v28, %v143_v27 }
   0xb   :  { %719 = vmatpush1.bf16.msra.mxu1 %v718_v15  ;;  %v148_v32 = vld [vmem:[%s1194_s4 + $0xa8] sm:$0xff]  ;;  %v708_v33 = vpack.c.bf16 %v40_v30, %v38_v29  ;;  %v39_v35 = vld [vmem:[%s1193_s3 + $0x10] sm:$0xff]  ;;  %v150_v37 = vld [vmem:[%s1194_s4 + $0xb8] sm:$0xff] }
   0xc   :  { %721 = vmatprep.subr.bf16.mxu1 %v720_v16  ;;  %v710_v38 = vpack.c.bf16 %v39_v35, %v37_v34  ;;  %v333_v39 = vld [vmem:[%s1196_s6 + $0x80] sm:$0xff]  ;;  %v334_v40 = vld [vmem:[%s1196_s6 + $0x88] sm:$0xff]  ;;  %v335_v44 = vld [vmem:[%s1196_s6 + $0x90] sm:$0xff]  ;;  %v732_v56 = vpack.c.bf16 %v150_v37, %v148_v32 }
   0xd   :  { %709 = vmatprep.subr.bf16.mxu0 %v708_v33  ;;  %v744_v41 = vpack.c.bf16 %v334_v40, %v333_v39  ;;  %v317_v42 = vld [vmem:[%s1196_s6] sm:$0xff]  ;;  %v318_v43 = vld [vmem:[%s1196_s6 + $0x8] sm:$0xff]  ;;  %v336_v50 = vld [vmem:[%s1196_s6 + $0x98] sm:$0xff] }
   0xe   :  { %711 = vmatpush1.bf16.msra.mxu0 %v710_v38  ;;  %v1000_v48 = vld [vmem:[%s1190_s0] sm:$0xff]  ;;  %v746_v49 = vpack.c.bf16 %v318_v43, %v317_v42  ;;  %v748_v53 = vpack.c.bf16 %v336_v50, %v335_v44  ;;  %v319_v54 = vld [vmem:[%s1196_s6 + $0x10] sm:$0xff]  ;;  %v320_v55 = vld [vmem:[%s1196_s6 + $0x18] sm:$0xff] }
   0xf   :  { %723 = vmatpush1.bf16.msra.mxu1 %v722_v21  ;;  %v147_v52 = vld [vmem:[%s1194_s4 + $0xa0] sm:$0xff]  ;;  %745 = vmatprep.subr.bf16.mxu0 %v744_v41  ;;  %v149_v57 = vld [vmem:[%s1194_s4 + $0xb0] sm:$0xff]  ;;  %v338_v59 = vld [vmem:[%s1196_s6 + $0xa8] sm:$0xff] }
  0x10   :  { %725 = vmatprep.subr.bf16.mxu1 %v724_v22  ;;  %v337_v58 = vld [vmem:[%s1196_s6 + $0xa0] sm:$0xff]  ;;  %v152_v60 = vld [vmem:[%s1194_s4 + $0xc8] sm:$0xff]  ;;  %v154_v61 = vld [vmem:[%s1194_s4 + $0xd8] sm:$0xff] }
  0x11   :  { %651 = vmatmul.mubr.msk.f32.vlgmr.msra.gmra.mrb[0].mxu0 %vm41_vm0, %v1000_v48 }
  0x13   :  { %727 = vmatpush1.bf16.msra.mxu1 %v726_v31 }
  0x14   :  { %729 = vmatprep.subr.bf16.mxu1 %v728_v36 }
  0x15   :  { %18 = vsyncpa [#allocation6], 0  ;;  %v151_v62 = vld [vmem:[%s1194_s4 + $0xc0] sm:$0xff]  ;;  %v164_v0 = vunpack.c.0.s8 %v163_v46  ;;  %v1037_v1 = vshrl.u32 %v165_v47, 7  ;;  %118 = vmatprep.mubr.f32.mxu0 %v841_v8  ;;  %v1043_v2 = vld [vmem:[%s1190_s0 + $0x8] sm:$0xff]  ;;  %747 = vmatpush3.bf16.msra.mxu0 %v746_v49  ;;  %v750_v3 = vpack.c.bf16 %v320_v55, %v319_v54  ;;  %v734_v4 = vpack.c.bf16 %v149_v57, %v147_v52 }
  0x16   :  { %v125_v63 = vld [vmem:[%s1191_s1] sm:$0x1]  ;;  %v126_v5 = vld [vmem:[%s1191_s1 + $0x1] sm:$0x1]  ;;  %749 = vmatprep.subr.bf16.mxu0 %v748_v53  ;;  %v752_v6 = vpack.c.bf16 %v338_v59, %v337_v58  ;;  %v322_v9 = vld [vmem:[%s1196_s6 + $0x28] sm:$0xff]  ;;  %v736_v10 = vpack.c.bf16 %v154_v61, %v152_v60  ;;  %652 = vmatmul.mubr.msk.f32.gmra.mrb[2].mxu0 %vm41_vm0, %v1043_v2  ;;  %v843_v55 = vmov 0  }
  0x17   :  { %731 = vmatpush1.bf16.msra.mxu1 %v730_v51  ;;  %v321_v7 = vld [vmem:[%s1196_s6 + $0x20] sm:$0xff]  ;;  %v153_v11 = vld [vmem:[%s1194_s4 + $0xd0] sm:$0xff]  ;;  %v340_v13 = vld [vmem:[%s1196_s6 + $0xb8] sm:$0xff]  ;;  %v161_v16 = vcombine.low %v125_v63, %v126_v5  ;;  %v1072_v17 = vsub.s32 %v164_v0, %v1037_v1  ;;  %784 = vset.pattern.permute.xlu0 %v843_v55  ;;  %v275_v0 = vsub.s32 0, %v1037_v1  ;;  %vm446_vm3 = vcmask 64512  }
  0x18   :  { %733 = vmatprep.subr.bf16.mxu1 %v732_v56  ;;  %v339_v12 = vld [vmem:[%s1196_s6 + $0xb0] sm:$0xff]  ;;  %v156_v14 = vld [vmem:[%s1194_s4 + $0xe8] sm:$0xff]  ;;  %v158_v15 = vld [vmem:[%s1194_s4 + $0xf8] sm:$0xff]  ;;  %v754_v18 = vpack.c.bf16 %v322_v9, %v321_v7  ;;  %v738_v19 = vpack.c.bf16 %v153_v11, %v151_v62  ;;  %vm844_vm6 = vmmov 0  }
  0x19   :  { %751 = vmatpush3.bf16.msra.mxu0 %v750_v3  ;;  %v756_v20 = vpack.c.bf16 %v340_v13, %v339_v12  ;;  %v323_v21 = vld [vmem:[%s1196_s6 + $0x30] sm:$0xff]  ;;  %v324_v22 = vld [vmem:[%s1196_s6 + $0x38] sm:$0xff]  ;;  %v740_v23 = vpack.c.bf16 %v158_v15, %v156_v14  ;;  %v155_v24 = vld [vmem:[%s1194_s4 + $0xe0] sm:$0xff]  ;;  %v168_v26 = vrot.slane %v161_v16, %v1072_v17 }
  0x1a   :  { %753 = vmatprep.subr.bf16.mxu0 %v752_v6  ;;  %v157_v25 = vld [vmem:[%s1194_s4 + $0xf0] sm:$0xff]  ;;  %v758_v27 = vpack.c.bf16 %v324_v22, %v323_v21  ;;  %v341_v30 = vld [vmem:[%s1196_s6 + $0xc0] sm:$0xff]  ;;  %v342_v31 = vld [vmem:[%s1196_s6 + $0xc8] sm:$0xff] }
  0x1b   :  { %735 = vmatpush1.bf16.msra.mxu1 %v734_v4  ;;  %v742_v28 = vpack.c.bf16 %v157_v25, %v155_v24  ;;  %v175_v29 = vrot.slane %v168_v26, %v1072_v17  ;;  %v760_v32 = vpack.c.bf16 %v342_v31, %v341_v30  ;;  %v325_v33 = vld [vmem:[%s1196_s6 + $0x40] sm:$0xff]  ;;  %v326_v34 = vld [vmem:[%s1196_s6 + $0x48] sm:$0xff]  ;;  %v343_v36 = vld [vmem:[%s1196_s6 + $0xd0] sm:$0xff]  ;;  %v279_v4 = vsub.s32 1, %v1037_v1 }
  0x1c   :  { %737 = vmatprep.subr.bf16.mxu1 %v736_v10  ;;  %v762_v35 = vpack.c.bf16 %v326_v34, %v325_v33  ;;  %v344_v37 = vld [vmem:[%s1196_s6 + $0xd8] sm:$0xff]  ;;  %v327_v39 = vld [vmem:[%s1196_s6 + $0x50] sm:$0xff]  ;;  %v345_v42 = vld [vmem:[%s1196_s6 + $0xe0] sm:$0xff] }
  0x1d   :  { %755 = vmatpush3.bf16.msra.mxu0 %v754_v18  ;;  %v764_v38 = vpack.c.bf16 %v344_v37, %v343_v36  ;;  %v328_v40 = vld [vmem:[%s1196_s6 + $0x58] sm:$0xff]  ;;  %v346_v43 = vld [vmem:[%s1196_s6 + $0xe8] sm:$0xff]  ;;  %v329_v45 = vld [vmem:[%s1196_s6 + $0x60] sm:$0xff] }
  0x1e   :  { %757 = vmatprep.subr.bf16.mxu0 %v756_v20  ;;  %v766_v41 = vpack.c.bf16 %v328_v40, %v327_v39  ;;  %v768_v44 = vpack.c.bf16 %v346_v43, %v345_v42  ;;  %v330_v46 = vld [vmem:[%s1196_s6 + $0x68] sm:$0xff]  ;;  %v348_v49 = vld [vmem:[%s1196_s6 + $0xf8] sm:$0xff]  ;;  %v331_v51 = vld [vmem:[%s1196_s6 + $0x70] sm:$0xff] }
  0x1f   :  { %739 = vmatpush1.bf16.msra.mxu1 %v738_v19  ;;  %v770_v47 = vpack.c.bf16 %v330_v46, %v329_v45  ;;  %v332_v52 = vld [vmem:[%s1196_s6 + $0x78] sm:$0xff]  ;;  %v653_v54 = vld [vmem:[#allocation2] ss:$0 sm:$0xff]  ;;  %v441_v36 = vld [vmem:[%s1192_s2 + $0x8] sm:$0xff] }
  0x20   :  { %741 = vmatprep.subr.bf16.mxu1 %v740_v23  ;;  %v774_v53 = vpack.c.bf16 %v332_v52, %v331_v51  ;;  %356 = vperm.xlu0 %784, %v653_v54   ;;  %v297_v3 = vld [vmem:[%s1195_s5] sm:$0x3]  ;;  %vm443_vm5 = vcmp.gt.f32.partialorder %v441_v36, 0.0 }
  0x21   :  { %759 = vmatpush3.bf16.msra.mxu0 %v758_v27  ;;  %v302_v7 = vrot.slane %v297_v3, %v275_v0  ;;  %v306_v11 = vrot.slane %v297_v3, %v279_v4  ;;  %v440_v30 = vld [vmem:[%s1192_s2] sm:$0xff]  ;;  %s845_s2 = smov [#allocation5]  }
  0x22   :  { %761 = vmatprep.subr.bf16.mxu0 %v760_v32  ;;  %vm442_vm2 = vcmp.gt.f32.partialorder %v440_v30, 0.0  ;;  %s636_s16 = sshll.u32 %s845_s2, 4  ;;  %s637_s16 = int_to_ptr.vmem [resolvable:$true] %s636_s16 }
  0x23   :  { %743 = vmatpush1.bf16.msra.mxu1 %v742_v28  ;;  %s793_s17 = scalar_lea.vmem %s637_s16, 256  ;;  %p798_p1 = scmp.lt.s32.totalorder %s637_s16, %s637_s16 }
  0x24   :  { %698 = vmatprep.subr.mxu1 %v841_v8  ;;  %p794_p0 = scmp.ne.s32.totalorder %s637_s16, %s793_s17  ;;  %p799_p2 = scmp.lt.s32.totalorder %s793_s17, %s793_s17 }
  0x25   :  { %763 = vmatpush3.bf16.msra.mxu0 %v762_v35 }
  0x26   :  { %242 = vmatmul.mubr.f32.vlgmr.msra.gmra.mrb[0].mxu1 %v175_v29  ;;  %765 = vmatprep.subr.bf16.mxu0 %v764_v38  ;;  %p800_p3 = por %p799_p2, %p798_p1 }
  0x27   :  { %699 = vmatpush3.msra.mxu1 %v1000_v48  ;;  %v347_v48 = vld [vmem:[%s1196_s6 + $0xf0] sm:$0xff]  ;;  %700 = vmatprep.mubr.msk.f32.mxu1 %vm844_vm6, %v841_v8 }
  0x28   :  { %703 = vmatprep.subr.mxu1 %v841_v8  ;;  %v772_v50 = vpack.c.bf16 %v348_v49, %v347_v48  ;;  %p801_p4 = pnand %p800_p3, %p794_p0 }
  0x29   :  { %767 = vmatpush3.bf16.msra.mxu0 %v766_v41 }
  0x2a   :  { %769 = vmatprep.subr.bf16.mxu0 %v768_v44 }
  0x2d   :  { %771 = vmatpush3.bf16.msra.mxu0 %v770_v47 }
  0x2e   :  { %773 = vmatprep.subr.bf16.mxu0 %v772_v50 }
  0x31   :  { %775 = vmatpush3.bf16.msra.mxu0 %v774_v53 }
  0x9f   :  { %v357_v28 = vpop.permute.xlu0 %356 }
  0xe4   :  { %v114_v56 = vpop.f32.mrb[0].mxu0 }
  0xe5   :  { %v116_v57 = vpop.f32.mrb[1].mxu0 }
  0xe9   :  { %v120_v58 = vpop.f32.mrb[2].mxu0 }
  0xea   :  { %v122_v59 = vpop.f32.mrb[3].mxu0 }
  0xf9   :  { %v243_v60 = vpop.f32.mrb[0].mxu1 }
  0xfa   :  { %v245_v61 = vpop.f32.mrb[1].mxu1 }
  0xfb   :  { %v250_v62 = vcombine.low %v243_v60, %v245_v61 }
  0xfd   :  { %v257_v63 = vrot.slane %v250_v62, %v1072_v17 }
  0xff   :  { %v258_v5 = vcombine.high %v257_v63, %v257_v63  ;;  %v265_v6 = vrot.slane %v257_v63, %v1072_v17 }
 0x101   :  { %v276_v9 = vrot.slane %v265_v6, %v275_v0  ;;  %v280_v10 = vrot.slane %v265_v6, %v279_v4  ;;  %v272_v12 = vrot.slane %v258_v5, %v1072_v17 }
 0x103   :  { %v293_v13 = vadd.f32 %v276_v9, %v114_v56  ;;  %v294_v14 = vadd.f32 %v280_v10, %v116_v57  ;;  %v284_v15 = vrot.slane %v272_v12, %v275_v0  ;;  %v288_v16 = vrot.slane %v272_v12, %v279_v4 }
 0x105   :  { %v309_v18 = vadd.f32 %v302_v7, %v293_v13  ;;  %v310_v19 = vadd.f32 %v306_v11, %v294_v14  ;;  %v295_v20 = vadd.f32 %v284_v15, %v120_v58  ;;  %v296_v21 = vadd.f32 %v288_v16, %v122_v59 }
 0x107   :  { %v313_v22 = vmax.f32 %v309_v18, 0.0  ;;  %v314_v23 = vmax.f32 %v310_v19, 0.0  ;;  %v312_v1 = vadd.f32 %v306_v11, %v296_v21  ;;  %v311_v24 = vadd.f32 %v302_v7, %v295_v20 }
 0x109   :  { %v316_v25 = vmax.f32 %v312_v1, 0.0  ;;  %423 = vmatprep.mubr.f32.mxu0 %v314_v23  ;;  %v315_v26 = vmax.f32 %v311_v24, 0.0 }
 0x10a   :  { %424 = vmatmul.mubr.f32.vlgmr.msra.gmra.mrb[4].mxu0 %v313_v22 }
 0x10b   :  { %428 = vmatprep.mubr.f32.mxu0 %v316_v25 }
 0x10e   :  { %429 = vmatmul.mubr.f32.gmra.mrb[6].mxu0 %v315_v26 }
 0x1dd   :  { %v688_v27 = vpop.f32.mrb[4].mxu0 }
 0x1de   :  { %v689_v17 = vpop.f32.mrb[5].mxu0 }
 0x1df   :  { %v690_v29 = vadd.f32 %v689_v17, %v688_v27 }
 0x1e1   :  { %v426_v31 = vadd.f32 %v690_v29, %v357_v28  ;;  %v691_v32 = vpop.f32.mrb[6].mxu0 }
 0x1e2   :  { %v692_v33 = vpop.f32.mrb[7].mxu0 }
 0x1e3   :  { %v436_v34 = vmul.f32 0.04, %v426_v31  ;;  %v693_v35 = vadd.f32 %v692_v33, %v691_v32  ;;  %vm434_vm1 = vcmp.gt.f32.partialorder %v426_v31, 0.0 }
 0x1e5   :  { %v431_v37 = vadd.f32 %v693_v35, %v357_v28  ;;  %v438_v38 = vsel %vm434_vm1, %v426_v31, %v436_v34 }
 0x1e6   :  { %v444_v39 = vsel %vm442_vm2, %v438_v38, -9e+15 }
 0x1e7   :  { %v447_v40 = vsel %vm446_vm3, %v444_v39, -inf  ;;  %vm435_vm4 = vcmp.gt.f32.partialorder %v431_v37, 0.0  ;;  %v437_v41 = vmul.f32 0.04, %v431_v37 }
 0x1e8   :  { %448 = vmax.xlane.f32.xlu0 %v447_v40 }
 0x1e9   :  { %v439_v42 = vsel %vm435_vm4, %v431_v37, %v437_v41 }
 0x1ea   :  { %v445_v43 = vsel %vm443_vm5, %v439_v42, -9e+15 }
 0x1eb   :  { %v450_v44 = vsel %vm446_vm3, %v445_v43, -inf }
 0x1ec   :  { %451 = vmax.xlane.f32.xlu1 %v450_v44 }
 0x275   :  { %v449_v45 = vpop.xlane.xlu0 %448 }
 0x276   :  { %v453_v46 = vsub.f32 %v444_v39, %v449_v45 }
 0x278   :  { %v455_v47 = vmul.f32 1.442695, %v453_v46 }
 0x279   :  { %v452_v48 = vpop.xlane.xlu1 %451 }
 0x27a   :  { %785 = vpow2.f32 %v455_v47  ;;  %v454_v49 = vsub.f32 %v445_v43, %v452_v48 }
 0x27c   :  { %v457_v50 = vmul.f32 1.442695, %v454_v49 }
 0x27e   :  { %787 = vpow2.f32 %v457_v50 }
 0x284   :  { %v786_v51 = vpop.eup %785 }
 0x285   :  { %v459_v52 = vsel %vm446_vm3, %v786_v51, 0.0 }
 0x286   :  { %460 = vadd.xlane.f32.xlu1 %v459_v52 }
 0x288   :  { %v788_v53 = vpop.eup %787 }
 0x289   :  { %v462_v54 = vsel %vm446_vm3, %v788_v53, 0.0 }
 0x28a   :  { %463 = vadd.xlane.f32.xlu1 %v462_v54 }
 0x313   :  { %v461_v55 = vpop.xlane.xlu1 %460 }
 0x314   :  { %789 = vrcp.f32 %v461_v55 }
 0x317   :  { %v464_v56 = vpop.xlane.xlu1 %463 }
 0x318   :  { %791 = vrcp.f32 %v464_v56 }
 0x31e   :  { %v790_v57 = vpop.eup %789 }
 0x31f   :  { %v466_v58 = vmul.f32 %v790_v57, %v786_v51 }
 0x321   :  { %469 = vst.msk [vmem:[#allocation5] sm:$0xff] %vm446_vm3, %v466_v58  ;;  %701 = vmatmul.mubr.msk.f32.vlgmr.msra.gmra.mrb[2].mxu1 %vm446_vm3, %v466_v58 }
 0x322   :  { %v792_v59 = vpop.eup %791  ;;  %704 = vmatpush3.msra.mxu1 %v1043_v2  ;;  %705 = vmatprep.mubr.msk.f32.mxu1 %vm844_vm6, %v841_v8 }
 0x323   :  { %v468_v60 = vmul.f32 %v792_v59, %v788_v53 }
 0x325   :  { %470 = vst.msk [vmem:[#allocation5 + $0x8] sm:$0xff] %vm446_vm3, %v468_v60  ;;  %706 = vmatmul.mubr.msk.f32.vlgmr.msra.gmra.mrb[4].mxu1 %vm446_vm3, %v468_v60 }
 0x326   :  { %804 = shalt.err (!%p801_p4)
}
 0x327   :  { %s805_s7 = scalar_lea.hbm %s1199_s9, 256 }
 0x328   :  { %p806_p5 = scmp.ne.s32.totalorder %s1199_s9, %s805_s7  ;;  %p809_p6 = scmp.lt.u32.totalorder %s805_s7, %s1199_s9 }
 0x32a   :  { %p811_p7 = pnand %p809_p6, %p806_p5 }
 0x32c   :  { %814 = shalt.err (!%p811_p7)
}
 0x32d   :  { %s846_s23 = smov 128   ;;  %s847_s3 = smov 8  }
 0x32e   :  { %642 = dma.vmem_to_hbm [thread:$0]  %s637_s16, 256, %s1199_s9, [#allocation6], %s846_s23, %s846_s23, %s847_s3  }
 0x32f   :  { %s848_s26 = smov [#allocation3]  }
 0x330   :  { %s624_s27 = sshll.u32 %s848_s26, 4  ;;  %s625_s27 = int_to_ptr.vmem [resolvable:$true] %s624_s27 }
 0x331   :  { %s815_s28 = scalar_lea.vmem %s625_s27, 256  ;;  %p820_p9 = scmp.lt.s32.totalorder %s625_s27, %s625_s27 }
 0x332   :  { %p816_p8 = scmp.ne.s32.totalorder %s625_s27, %s815_s28  ;;  %p821_p10 = scmp.lt.s32.totalorder %s815_s28, %s815_s28 }
 0x334   :  { %p822_p11 = por %p821_p10, %p820_p9 }
 0x336   :  { %p823_p12 = pnand %p822_p11, %p816_p8 }
 0x3f4   :  { %v540_v8 = vpop.f32.mrb[2].mxu1 }
 0x3f5   :  { %617 = vst.msk [vmem:[#allocation3] sm:$0xff] %vm41_vm0, %v540_v8  ;;  %v702_v2 = vpop.f32.mrb[3].mxu1 }
 0x3f8   :  { %v613_v61 = vpop.f32.mrb[4].mxu1 }
 0x3f9   :  { %618 = vst.msk [vmem:[#allocation3 + $0x8] sm:$0xff] %vm41_vm0, %v613_v61  ;;  %v707_v62 = vpop.f32.mrb[5].mxu1 }
 0x3fa   :  { %826 = shalt.err (!%p823_p12)
}
 0x3fb   :  { %s827_s29 = scalar_lea.hbm %s1198_s8, 256 }
 0x3fc   :  { %p828_p13 = scmp.ne.s32.totalorder %s1198_s8, %s827_s29  ;;  %p831_p0 = scmp.lt.u32.totalorder %s827_s29, %s1198_s8 }
 0x3fe   :  { %p833_p1 = pnand %p831_p0, %p828_p13 }
 0x400   :  { %836 = shalt.err (!%p833_p1)
}
 0x401   :  { %630 = dma.vmem_to_hbm [thread:$0]  %s625_s27, 256, %s1198_s8, [#allocation4], %s846_s23, %s846_s23, %s847_s3  }
 0x402   :  { %837 = dma.done.wait [#allocation4], 256  }
 0x403   :  { %838 = vsyncadd [#allocation4], 4294967040 }
 0x404   :  { %839 = dma.done.wait [#allocation6], 256  }
 0x405   :  { %840 = vsyncadd [#allocation6], 4294967040 }
 0x406   :  { %649 = vsyncpa [#allocation4], 1 }
 0x407   :  { %650 = vsyncpa [#allocation6], 1 }

</bundles_post_ra>
